<compile_context>
chip_gen: v7x
topology: tpu7x:2x2x1
jax: 0.10.0
libtpu: 0.0.40
codegen_flags: <defaults>
</compile_context>

<pallas_src>
import functools

import numpy as np
import jax
import jax.numpy as jnp
from jax.experimental import pallas as pl
from jax.experimental.pallas import tpu as pltpu

LANE = 128


def _rudder_prop_kernel(cio_ref, out_ref, *, one_minus_w, c0, c1p, c2p, lx, ly, lz):
    # cio_ref: (5, TR, 128) = (n_rpm, delta_left, delta_right, u, v)
    n = cio_ref[0]          # rpm; the 1/60 conversion is folded into c1p/c2p
    u = cio_ref[3]
    v = cio_ref[4]

    # Shared n-terms (nl == nr in the reference module).
    qn = c1p * n            # rho d^3 kt1 * (n/60)
    cn2 = c2p * (n * n)     # rho d^4 kt2 * (n/60)^2

    # ---- left propeller branch (kept first to bound peak tile liveness) ----
    deltal = cio_ref[1]
    cos_dl = jnp.cos(deltal)
    sin_dl = jnp.sin(deltal)
    val = jnp.maximum(one_minus_w * (cos_dl * u + sin_dl * v), 0.0)
    tl = jnp.maximum(c0 * (val * val) + qn * val + cn2, 0.0)
    fxl = cos_dl * tl
    fyl = sin_dl * tl

    # ---- right propeller branch ----
    deltar = cio_ref[2]
    cos_dr = jnp.cos(deltar)
    sin_dr = jnp.sin(deltar)
    var = jnp.maximum(one_minus_w * (cos_dr * u + sin_dr * v), 0.0)
    tr = jnp.maximum(c0 * (var * var) + qn * var + cn2, 0.0)
    fxr = cos_dr * tr
    fyr = sin_dr * tr

    # Per-channel unmasked 128-lane stores; no stacked (4,TR,128) temporary.
    fy_sum = fyl + fyr
    out_ref[0] = fxl + fxr
    out_ref[1] = fy_sum
    out_ref[2] = -lz * fy_sum
    out_ref[3] = lx * fy_sum + ly * (fxl - fxr)


def make_constants(wake_factor, diameter, rho_water, thrust_coefficient, propeller_location):
    """Fuse the module's non-trainable scalars once at init time (plain floats)."""
    kt = np.asarray(thrust_coefficient, dtype=np.float64)
    loc = np.asarray(propeller_location, dtype=np.float64).reshape(-1)
    if loc.size != 3:
        raise ValueError("Propeller location relative to COG has expected form (lx, ly, lz).")
    d = float(diameter)
    rho = float(rho_water)
    return dict(
        one_minus_w=float(1.0 - float(wake_factor)),
        c0=float(rho * d ** 2 * kt[0]),
        c1p=float(rho * d ** 3 * kt[1] / 60.0),      # 1/60 rpm->rps folded in
        c2p=float(rho * d ** 4 * kt[2] / 3600.0),    # (1/60)^2 folded in
        lx=float(loc[0]),
        ly=float(loc[1]),
        lz=float(loc[2]),
    )


def _pick_row_block(num_rows, block_rows):
    """(8,128)-legal row block; prefers >=2 grid steps so v7x megacore splits."""
    if num_rows <= 8:
        return max(num_rows, 1)
    if num_rows % 8 != 0:
        raise ValueError("packed row count must be a multiple of 8 (pad the batch).")
    cap = min(int(block_rows), num_rows // 2)
    cap = max(8, (cap // 8) * 8)
    for tr in range(cap, 7, -8):
        if num_rows % tr == 0:
            return tr
    return 8


def symmetric_rudder_propeller_pair_packed(constants, cio_packed, *, block_rows=2048):
    """Feature-major fast path (no wrapper transposes).

    cio_packed: (5, R, 128) f32 with channels (n_rpm, delta_l, delta_r, u, v),
    batch packed lane-dense: element (c, r, l) == channel c of item r*128+l.
    R must be <= 8 or a multiple of 8.  Returns (4, R, 128) f32 tau_control.
    """
    C, R, lane = cio_packed.shape
    assert C == 5 and lane == LANE
    tr = _pick_row_block(R, block_rows)
    grid = (R // tr,)
    kernel = functools.partial(_rudder_prop_kernel, **constants)
    return pl.pallas_call(
        kernel,
        out_shape=jax.ShapeDtypeStruct((4, R, LANE), jnp.float32),
        grid_spec=pltpu.PrefetchScalarGridSpec(
            num_scalar_prefetch=0,
            grid=grid,
            in_specs=[pl.BlockSpec((5, tr, LANE), lambda i: (0, i, 0))],
            out_specs=pl.BlockSpec((4, tr, LANE), lambda i: (0, i, 0)),
        ),
        compiler_params=pltpu.CompilerParams(
            dimension_semantics=("parallel",),          # megacore split on v7x
            vmem_limit_bytes=48 * 1024 * 1024,          # fits v5e/v6e/v7x VMEM
        ),
    )(cio_packed)


def symmetric_rudder_propeller_pair(constants, control, velocity, *, block_rows=2048):
    """Drop-in (batch-major) API matching the PyTorch module.

    control: (B, 3), velocity: (B, V>=2).  Returns tau_control: (B, 4).
    Note: this wrapper pays one XLA repack pass per side; feed the packed
    entry point directly if the producer/consumer can stay feature-major.
    """
    B = control.shape[0]
    R = pl.cdiv(B, LANE)
    r_pad = R if R <= 8 else ((R + 7) // 8) * 8
    b_pad = r_pad * LANE

    # Single combined (B, 5) slab -> one transpose/pad pass, one DMA stream.
    cio = jnp.concatenate(
        [control.astype(jnp.float32), velocity[:, :2].astype(jnp.float32)], axis=1
    )
    if b_pad != B:
        cio = jnp.pad(cio, ((0, b_pad - B), (0, 0)))
    cio_packed = jnp.transpose(cio).reshape(5, r_pad, LANE)

    out_packed = symmetric_rudder_propeller_pair_packed(
        constants, cio_packed, block_rows=block_rows
    )
    return jnp.transpose(out_packed.reshape(4, b_pad)[:, :B])


def _reference_numpy(wake_factor, diameter, rho_water, kt, loc, control, velocity):
    """Pure NumPy transcription of the PyTorch forward for verification."""
    w, d, rho = float(wake_factor), float(diameter), float(rho_water)
    kt = np.asarray(kt, dtype=np.float64)
    lx, ly, lz = (float(loc[0]), float(loc[1]), float(loc[2]))
    c = np.asarray(control, dtype=np.float64)
    vel = np.asarray(velocity, dtype=np.float64)
    u, v = vel[:, 0], vel[:, 1]
    nl = nr = c[:, 0] / 60.0
    dl, dr = c[:, 1], c[:, 2]
    relu = lambda x: np.maximum(x, 0.0)
    val = relu((1.0 - w) * (np.cos(dl) * u + np.sin(dl) * v))
    var = relu((1.0 - w) * (np.cos(dr) * u + np.sin(dr) * v))
    xl = np.stack([rho * d**2 * val * val, rho * d**3 * val * nl, rho * d**4 * nl * nl], axis=1)
    tl = relu(xl @ kt)
    xr = np.stack([rho * d**2 * var * var, rho * d**3 * var * nr, rho * d**4 * nr * nr], axis=1)
    tr = relu(xr @ kt)
    fxl, fxr = np.cos(dl) * tl, np.cos(dr) * tr
    fyl, fyr = np.sin(dl) * tl, np.sin(dr) * tr
    return np.stack(
        [fxl + fxr, fyl + fyr, lz * (-fyl - fyr), lx * (fyl + fyr) + ly * (fxl - fxr)],
        axis=1,
    )


if __name__ == "__main__":
    # Deterministic physical parameters (module __init__ arguments).
    wake_factor = 0.2
    diameter = 1.5
    rho_water = 1025.0
    thrust_coefficient = np.array([0.5, -0.2, 0.1], dtype=np.float64)
    propeller_location = np.array([-2.0, 0.8, -0.5], dtype=np.float64)
    constants = make_constants(
        wake_factor, diameter, rho_water, thrust_coefficient, propeller_location
    )

    def run_and_check(batch, key, block_rows):
        k1, k2, k3 = jax.random.split(key, 3)
        control = jnp.concatenate(
            [
                jax.random.uniform(k1, (batch, 1), jnp.float32, 0.0, 300.0),   # n [1/min]
                jax.random.uniform(k2, (batch, 2), jnp.float32, -0.5, 0.5),    # rudder angles
            ],
            axis=1,
        )
        velocity = jax.random.normal(k3, (batch, 6), jnp.float32) * 2.0
        tau = symmetric_rudder_propeller_pair(
            constants, control, velocity, block_rows=block_rows
        )
        tau = jax.block_until_ready(tau)
        ref = _reference_numpy(
            wake_factor, diameter, rho_water, thrust_coefficient, propeller_location,
            np.asarray(control), np.asarray(velocity),
        )
        np.testing.assert_allclose(np.asarray(tau, dtype=np.float64), ref, rtol=1e-4, atol=0.05)

    key = jax.random.PRNGKey(0)
    # Tiny single-block case (B=8 -> one (1,128) lane row, grid=(1,)).
    run_and_check(8, key, 2048)
    # Padded multi-step case (B=2000 -> 16 packed rows, grid=(2,) at the default block).
    run_and_check(2000, jax.random.fold_in(key, 1), 2048)
    # Explicit small row block to exercise the pipelined multi-step grid path.
    run_and_check(2000, jax.random.fold_in(key, 2), 8)

    print("KERNEL_OK")
</pallas_src>

<mosaic_0001>
module attributes {stable_mosaic.version = 11 : i64} {
  func.func @_rudder_prop_kernel(%arg0: i32, %arg1: memref<5x1x128xf32, #tpu.memory_space<vmem>>, %arg2: memref<4x1x128xf32, #tpu.memory_space<vmem>>) attributes {dimension_semantics = [#tpu.dimension_semantics<parallel>], iteration_bounds = array<i64: 1>, scalar_prefetch = 0 : i64, scratch_operands = 0 : i64, tpu.core_type = #tpu.core_type<tc>, window_params = [{transform_indices = @transform_0, window_bounds = array<i64: 5, 1, 128>}, {transform_indices = @transform_1, window_bounds = array<i64: 4, 1, 128>}]} {
    %c0 = arith.constant 0 : index
    %c0_0 = arith.constant 0 : index
    %c0_1 = arith.constant 0 : index
    %0 = vector.load %arg1[%c0, %c0_0, %c0_1] : memref<5x1x128xf32, #tpu.memory_space<vmem>>, vector<1x1x128xf32>
    %1 = vector.shape_cast %0 : vector<1x1x128xf32> to vector<1x128xf32>
    %c3 = arith.constant 3 : index
    %c0_2 = arith.constant 0 : index
    %c0_3 = arith.constant 0 : index
    %2 = vector.load %arg1[%c3, %c0_2, %c0_3] : memref<5x1x128xf32, #tpu.memory_space<vmem>>, vector<1x1x128xf32>
    %3 = vector.shape_cast %2 : vector<1x1x128xf32> to vector<1x128xf32>
    %c4 = arith.constant 4 : index
    %c0_4 = arith.constant 0 : index
    %c0_5 = arith.constant 0 : index
    %4 = vector.load %arg1[%c4, %c0_4, %c0_5] : memref<5x1x128xf32, #tpu.memory_space<vmem>>, vector<1x1x128xf32>
    %5 = vector.shape_cast %4 : vector<1x1x128xf32> to vector<1x128xf32>
    %cst = arith.constant -11.53125 : f32
    %6 = vector.broadcast %cst : f32 to vector<1x128xf32>
    %7 = arith.mulf %6, %1 : vector<1x128xf32>
    %8 = arith.mulf %1, %1 : vector<1x128xf32>
    %cst_6 = arith.constant 0.144140631 : f32
    %9 = vector.broadcast %cst_6 : f32 to vector<1x128xf32>
    %10 = arith.mulf %9, %8 : vector<1x128xf32>
    %c1 = arith.constant 1 : index
    %c0_7 = arith.constant 0 : index
    %c0_8 = arith.constant 0 : index
    %11 = vector.load %arg1[%c1, %c0_7, %c0_8] : memref<5x1x128xf32, #tpu.memory_space<vmem>>, vector<1x1x128xf32>
    %12 = vector.shape_cast %11 : vector<1x1x128xf32> to vector<1x128xf32>
    %13 = math.cos %12 : vector<1x128xf32>
    %14 = math.sin %12 : vector<1x128xf32>
    %15 = arith.mulf %13, %3 : vector<1x128xf32>
    %16 = arith.mulf %14, %5 : vector<1x128xf32>
    %17 = arith.addf %15, %16 : vector<1x128xf32>
    %cst_9 = arith.constant 8.000000e-01 : f32
    %18 = vector.broadcast %cst_9 : f32 to vector<1x128xf32>
    %19 = arith.mulf %18, %17 : vector<1x128xf32>
    %cst_10 = arith.constant 0.000000e+00 : f32
    %20 = vector.broadcast %cst_10 : f32 to vector<1x128xf32>
    %21 = arith.maximumf %19, %20 : vector<1x128xf32>
    %22 = arith.mulf %21, %21 : vector<1x128xf32>
    %cst_11 = arith.constant 1153.125 : f32
    %23 = vector.broadcast %cst_11 : f32 to vector<1x128xf32>
    %24 = arith.mulf %23, %22 : vector<1x128xf32>
    %25 = arith.mulf %7, %21 : vector<1x128xf32>
    %26 = arith.addf %24, %25 : vector<1x128xf32>
    %27 = arith.addf %26, %10 : vector<1x128xf32>
    %cst_12 = arith.constant 0.000000e+00 : f32
    %28 = vector.broadcast %cst_12 : f32 to vector<1x128xf32>
    %29 = arith.maximumf %27, %28 : vector<1x128xf32>
    %30 = arith.mulf %13, %29 : vector<1x128xf32>
    %31 = arith.mulf %14, %29 : vector<1x128xf32>
    %c2 = arith.constant 2 : index
    %c0_13 = arith.constant 0 : index
    %c0_14 = arith.constant 0 : index
    %32 = vector.load %arg1[%c2, %c0_13, %c0_14] : memref<5x1x128xf32, #tpu.memory_space<vmem>>, vector<1x1x128xf32>
    %33 = vector.shape_cast %32 : vector<1x1x128xf32> to vector<1x128xf32>
    %34 = math.cos %33 : vector<1x128xf32>
    %35 = math.sin %33 : vector<1x128xf32>
    %36 = arith.mulf %34, %3 : vector<1x128xf32>
    %37 = arith.mulf %35, %5 : vector<1x128xf32>
    %38 = arith.addf %36, %37 : vector<1x128xf32>
    %cst_15 = arith.constant 8.000000e-01 : f32
    %39 = vector.broadcast %cst_15 : f32 to vector<1x128xf32>
    %40 = arith.mulf %39, %38 : vector<1x128xf32>
    %cst_16 = arith.constant 0.000000e+00 : f32
    %41 = vector.broadcast %cst_16 : f32 to vector<1x128xf32>
    %42 = arith.maximumf %40, %41 : vector<1x128xf32>
    %43 = arith.mulf %42, %42 : vector<1x128xf32>
    %cst_17 = arith.constant 1153.125 : f32
    %44 = vector.broadcast %cst_17 : f32 to vector<1x128xf32>
    %45 = arith.mulf %44, %43 : vector<1x128xf32>
    %46 = arith.mulf %7, %42 : vector<1x128xf32>
    %47 = arith.addf %45, %46 : vector<1x128xf32>
    %48 = arith.addf %47, %10 : vector<1x128xf32>
    %cst_18 = arith.constant 0.000000e+00 : f32
    %49 = vector.broadcast %cst_18 : f32 to vector<1x128xf32>
    %50 = arith.maximumf %48, %49 : vector<1x128xf32>
    %51 = arith.mulf %34, %50 : vector<1x128xf32>
    %52 = arith.mulf %35, %50 : vector<1x128xf32>
    %53 = arith.addf %31, %52 : vector<1x128xf32>
    %54 = arith.addf %30, %51 : vector<1x128xf32>
    %c0_19 = arith.constant 0 : index
    %c0_20 = arith.constant 0 : index
    %c0_21 = arith.constant 0 : index
    %55 = vector.load %arg2[%c0_19, %c0_20, %c0_21] : memref<4x1x128xf32, #tpu.memory_space<vmem>>, vector<1x1x128xf32>
    %56 = vector.shape_cast %55 : vector<1x1x128xf32> to vector<1x128xf32>
    %57 = vector.shape_cast %54 : vector<1x128xf32> to vector<1x1x128xf32>
    tpu.vector_store %arg2[%c0_19, %c0_20, %c0_21], %57 {strides = array<i32>} : memref<4x1x128xf32, #tpu.memory_space<vmem>>, vector<1x1x128xf32>,
    %c1_22 = arith.constant 1 : index
    %c0_23 = arith.constant 0 : index
    %c0_24 = arith.constant 0 : index
    %58 = vector.load %arg2[%c1_22, %c0_23, %c0_24] : memref<4x1x128xf32, #tpu.memory_space<vmem>>, vector<1x1x128xf32>
    %59 = vector.shape_cast %58 : vector<1x1x128xf32> to vector<1x128xf32>
    %60 = vector.shape_cast %53 : vector<1x128xf32> to vector<1x1x128xf32>
    tpu.vector_store %arg2[%c1_22, %c0_23, %c0_24], %60 {strides = array<i32>} : memref<4x1x128xf32, #tpu.memory_space<vmem>>, vector<1x1x128xf32>,
    %cst_25 = arith.constant 5.000000e-01 : f32
    %61 = vector.broadcast %cst_25 : f32 to vector<1x128xf32>
    %62 = arith.mulf %61, %53 : vector<1x128xf32>
    %c2_26 = arith.constant 2 : index
    %c0_27 = arith.constant 0 : index
    %c0_28 = arith.constant 0 : index
    %63 = vector.load %arg2[%c2_26, %c0_27, %c0_28] : memref<4x1x128xf32, #tpu.memory_space<vmem>>, vector<1x1x128xf32>
    %64 = vector.shape_cast %63 : vector<1x1x128xf32> to vector<1x128xf32>
    %65 = vector.shape_cast %62 : vector<1x128xf32> to vector<1x1x128xf32>
    tpu.vector_store %arg2[%c2_26, %c0_27, %c0_28], %65 {strides = array<i32>} : memref<4x1x128xf32, #tpu.memory_space<vmem>>, vector<1x1x128xf32>,
    %cst_29 = arith.constant -2.000000e+00 : f32
    %66 = vector.broadcast %cst_29 : f32 to vector<1x128xf32>
    %67 = arith.mulf %66, %53 : vector<1x128xf32>
    %68 = arith.subf %30, %51 : vector<1x128xf32>
    %cst_30 = arith.constant 8.000000e-01 : f32
    %69 = vector.broadcast %cst_30 : f32 to vector<1x128xf32>
    %70 = arith.mulf %69, %68 : vector<1x128xf32>
    %71 = arith.addf %67, %70 : vector<1x128xf32>
    %c3_31 = arith.constant 3 : index
    %c0_32 = arith.constant 0 : index
    %c0_33 = arith.constant 0 : index
    %72 = vector.load %arg2[%c3_31, %c0_32, %c0_33] : memref<4x1x128xf32, #tpu.memory_space<vmem>>, vector<1x1x128xf32>
    %73 = vector.shape_cast %72 : vector<1x1x128xf32> to vector<1x128xf32>
    %74 = vector.shape_cast %71 : vector<1x128xf32> to vector<1x1x128xf32>
    tpu.vector_store %arg2[%c3_31, %c0_32, %c0_33], %74 {strides = array<i32>} : memref<4x1x128xf32, #tpu.memory_space<vmem>>, vector<1x1x128xf32>,
    return
  }
  func.func @transform_0(%arg0: i32) -> (i32, i32, i32) {
    %c0_i32 = arith.constant 0 : i32
    %c0_i32_0 = arith.constant 0 : i32
    %c0_i32_1 = arith.constant 0 : i32
    return %c0_i32, %arg0, %c0_i32_0 : i32, i32, i32
  }
  func.func @transform_1(%arg0: i32) -> (i32, i32, i32) {
    %c0_i32 = arith.constant 0 : i32
    %c0_i32_0 = arith.constant 0 : i32
    %c0_i32_1 = arith.constant 0 : i32
    return %c0_i32, %arg0, %c0_i32_0 : i32, i32, i32
  }
}

</mosaic_0001>

<bundles_post_ra>
// kernel: tpu_custom_call.1
= control target key start
LH: loop header
LB: loop body
LE: loop exit
PB: predicated region body
PF: predicated region fallthrough
CT: control target
= control target key end

     0   :  { %6 = vsyncpa [#allocation3], 0  ;;  %s716_s0 = inlined_call_operand.hbm [shape: f32[5,1,128], index: 0, kind: input, shape index: {}]   ;;  %s717_s1 = inlined_call_operand.hbm [shape: f32[4,1,128], index: 1, kind: output, shape index: {}]  }
   0x1   :  { %7 = vsyncpa [#allocation4], 0  ;;  %s596_s6 = smov [#allocation2]   ;;  %s548_s10 = scalar_lea.hbm %s716_s0, 80 }
   0x2   :  { %s13_s7 = sshll.u32 %s596_s6, 4  ;;  %p549_p0 = scmp.ne.s32.totalorder %s716_s0, %s548_s10  ;;  %s14_s7 = int_to_ptr.vmem [resolvable:$true] %s13_s7 }
   0x3   :  { %p552_p1 = scmp.lt.u32.totalorder %s548_s10, %s716_s0 }
   0x5   :  { %p554_p2 = pnand %p552_p1, %p549_p0 }
   0x7   :  { %557 = shalt.err (!%p554_p2)
}
   0x8   :  { %s558_s15 = scalar_lea.vmem %s14_s7, 80  ;;  %s562_s16 = scalar_lea.vmem %s14_s7, 96 }
   0x9   :  { %p559_p3 = scmp.ne.s32.totalorder %s14_s7, %s558_s15  ;;  %p563_p4 = scmp.lt.s32.totalorder %s14_s7, %s14_s7 }
   0xa   :  { %p564_p5 = scmp.lt.s32.totalorder %s562_s16, %s558_s15 }
   0xc   :  { %p565_p6 = por %p564_p5, %p563_p4 }
   0xe   :  { %p566_p7 = pnand %p565_p6, %p559_p3 }
  0x10   :  { %569 = shalt.err (!%p566_p7)
}
  0x11   :  { %s597_s17 = smov 16   ;;  %s598_s18 = smov 1  }
  0x12   :  { %19 = dma.hbm_to_vmem [thread:$0]  %s716_s0, 80, %s14_s7, [#allocation3], %s597_s17, %s597_s17, %s598_s18  }
  0x13   :  { %592 = dma.done.wait [#allocation3], 80  }
  0x14   :  { %593 = vsyncadd [#allocation3], 4294967216  ;;  %v631_v0 = vld [vmem:[#allocation2 + $0x1] sm:$0x1]  ;;  %v633_v1 = vld [vmem:[#allocation2 + $0x2] sm:$0x1] }
  0x15   :  { %v33_v2 = vand.u32 2147483647, %v631_v0  ;;  %v36_v3 = vand.u32 2139095040, %v631_v0  ;;  %v255_v4 = vand.u32 2147483647, %v633_v1  ;;  %v258_v5 = vand.u32 2139095040, %v633_v1 }
  0x16   :  { %v599_v24 = vmov 683565275   ;;  %v600_v26 = vmov 2475754826   ;;  %v601_v28 = vmov 2131351028  }
  0x17   :  { %v37_v6 = vshrl.u32 %v36_v3, 23  ;;  %v40_v7 = vand.u32 8388607, %v33_v2  ;;  %v259_v8 = vshrl.u32 %v258_v5, 23  ;;  %v262_v9 = vand.u32 8388607, %v255_v4 }
  0x18   :  { %v602_v30 = vmov 2102212464   ;;  %v603_v32 = vmov 920167782   ;;  %v604_v40 = vmov 1326507024  }
  0x19   :  { %v506_v10 = vadd.s32 4294967169, %v37_v6  ;;  %v514_v11 = vadd.s32 4294967169, %v259_v8  ;;  %v41_v13 = vor.u32 8388608, %v40_v7  ;;  %v263_v14 = vor.u32 8388608, %v262_v9  ;;  %s605_s0 = smov [#allocation5]  }
  0x1a   :  { %vm35_vm14 = vcmp.lt.s32.totalorder %v631_v0, 0  ;;  %vm34_vm15 = vcmp.le.f32.partialorder %v33_v2, 0.7853982  ;;  %s494_s21 = sshll.u32 %s605_s0, 4  ;;  %s495_s21 = int_to_ptr.vmem [resolvable:$true] %s494_s21 }
  0x1b   :  { %v43_v12 = vadd.s32 1, %v506_v10  ;;  %v265_v15 = vadd.s32 1, %v514_v11  ;;  %v643_v20 = vshll.u32 %v41_v13, 8  ;;  %v645_v22 = vshll.u32 %v263_v14, 8  ;;  %s570_s22 = scalar_lea.vmem %s495_s21, 64  ;;  %p575_p9 = scmp.lt.s32.totalorder %s495_s21, %s495_s21 }
  0x1c   :  { %p571_p8 = scmp.ne.s32.totalorder %s495_s21, %s570_s22  ;;  %p576_p10 = scmp.lt.s32.totalorder %s570_s22, %s570_s22 }
  0x1d   :  { %vm44_vm0 = vcmp.gt.s32.totalorder %v43_v12, 0  ;;  %vm266_vm1 = vcmp.gt.s32.totalorder %v265_v15, 0 }
  0x1e   :  { %v45_v16 = vsel %vm44_vm0, %v43_v12, 0  ;;  %v267_v19 = vsel %vm266_vm1, %v265_v15, 0  ;;  %vm257_vm0 = vcmp.lt.s32.totalorder %v633_v1, 0  ;;  %vm256_vm1 = vcmp.le.f32.partialorder %v255_v4, 0.7853982  ;;  %p577_p11 = por %p576_p10, %p575_p9 }
  0x1f   :  { %v46_v17 = vshrl.u32 %v45_v16, 5  ;;  %v47_v18 = vand.u32 31, %v45_v16  ;;  %v269_v21 = vand.u32 31, %v267_v19  ;;  %v647_v34 = vshrl.u32 %v267_v19, 5 }
  0x20   :  { %p578_p12 = pnand %p577_p11, %p571_p8 }
  0x21   :  { %v48_v23 = vsub.s32 32, %v47_v18  ;;  %v50_v25 = vshll.u32 %v599_v24, %v47_v18  ;;  %v53_v27 = vshll.u32 %v600_v26, %v47_v18  ;;  %v56_v29 = vshll.u32 %v601_v28, %v47_v18 }
  0x22   :  { %v59_v31 = vshll.u32 %v602_v30, %v47_v18  ;;  %v62_v33 = vshll.u32 %v603_v32, %v47_v18  ;;  %vm65_vm2 = vcmp.lt.s32.totalorder %v46_v17, 1  ;;  %vm66_vm3 = vcmp.lt.s32.totalorder %v46_v17, 2 }
  0x23   :  { %v49_v35 = vshrl.u32 %v599_v24, %v48_v23  ;;  %v51_v36 = vshrl.u32 %v600_v26, %v48_v23  ;;  %v54_v37 = vshrl.u32 %v601_v28, %v48_v23  ;;  %v57_v38 = vshrl.u32 %v602_v30, %v48_v23 }
  0x24   :  { %v60_v39 = vshrl.u32 %v603_v32, %v48_v23  ;;  %v63_v41 = vshrl.u32 %v604_v40, %v48_v23  ;;  %vm68_vm4 = vcmp.lt.s32.totalorder %v46_v17, 4  ;;  %v270_v45 = vsub.s32 32, %v269_v21 }
  0x25   :  { %v52_v42 = vor.u32 %v51_v36, %v50_v25  ;;  %v55_v43 = vor.u32 %v54_v37, %v53_v27  ;;  %v58_v44 = vor.u32 %v57_v38, %v56_v29  ;;  %vm67_vm5 = vcmp.lt.s32.totalorder %v46_v17, 3 }
  0x26   :  { %v61_v46 = vor.u32 %v60_v39, %v59_v31  ;;  %v64_v47 = vor.u32 %v63_v41, %v62_v33  ;;  %v272_v48 = vshll.u32 %v599_v24, %v269_v21  ;;  %v275_v56 = vshll.u32 %v600_v26, %v269_v21 }
  0x27   :  { %v69_v49 = vsel %vm65_vm2, %v49_v35, %v52_v42  ;;  %v70_v50 = vsel %vm68_vm4, %v58_v44, 2102212464  ;;  %v73_v51 = vsel %vm65_vm2, %v52_v42, %v55_v43  ;;  %v77_v52 = vsel %vm65_vm2, %v55_v43, %v58_v44 }
  0x28   :  { %v71_v53 = vsel %vm67_vm5, %v55_v43, %v70_v50  ;;  %v74_v54 = vsel %vm68_vm4, %v61_v46, 920167782  ;;  %v78_v55 = vsel %vm68_vm4, %v64_v47, 1326507024  ;;  %v271_v59 = vshrl.u32 %v599_v24, %v270_v45 }
  0x29   :  { %v75_v57 = vsel %vm67_vm5, %v58_v44, %v74_v54  ;;  %v79_v58 = vsel %vm67_vm5, %v61_v46, %v78_v55  ;;  %v273_v60 = vshrl.u32 %v600_v26, %v270_v45  ;;  %v72_v61 = vsel %vm66_vm3, %v69_v49, %v71_v53 }
  0x2a   :  { %v76_v62 = vsel %vm66_vm3, %v73_v51, %v75_v57  ;;  %v80_v63 = vsel %vm66_vm3, %v77_v52, %v79_v58  ;;  %v276_v3 = vshrl.u32 %v601_v28, %v270_v45  ;;  %v278_v11 = vshll.u32 %v601_v28, %v269_v21 }
  0x2b   :  { %v656_v5 = vmul.u32.u64.low %v643_v20, %v80_v63  ;;  %v657_v6 = vmul.u32.u64.high %v643_v20, %v80_v63, %v656_v5  ;;  %v660_v7 = vmul.u32.u64.low %v643_v20, %v76_v62  ;;  %v661_v8 = vmul.u32.u64.high %v643_v20, %v76_v62, %v660_v7 }
  0x2c   :  { %v274_v9 = vor.u32 %v273_v60, %v272_v48  ;;  %v277_v10 = vor.u32 %v276_v3, %v275_v56  ;;  %v279_v12 = vshrl.u32 %v602_v30, %v270_v45  ;;  %v281_v13 = vshll.u32 %v602_v30, %v269_v21 }
  0x2d   :  { %v282_v14 = vshrl.u32 %v603_v32, %v270_v45  ;;  %v284_v15 = vshll.u32 %v603_v32, %v269_v21  ;;  %v285_v16 = vshrl.u32 %v604_v40, %v270_v45  ;;  %v88_v17 = vmul.u32 %v643_v20, %v72_v61 }
  0x2e   :  { %v280_v18 = vor.u32 %v279_v12, %v278_v11  ;;  %vm287_vm6 = vcmp.lt.s32.totalorder %v647_v34, 1  ;;  %vm288_vm7 = vcmp.lt.s32.totalorder %v647_v34, 2  ;;  %vm90_vm8 = vc.u32 %v657_v6, %v660_v7 }
  0x2f   :  { %v91_v19 = vadd.s32 1, %v661_v8  ;;  %v283_v23 = vor.u32 %v282_v14, %v281_v13  ;;  %vm289_vm9 = vcmp.lt.s32.totalorder %v647_v34, 3  ;;  %v286_v24 = vor.u32 %v285_v16, %v284_v15 }
  0x30   :  { %vm290_vm10 = vcmp.lt.s32.totalorder %v647_v34, 4  ;;  %v291_v25 = vsel %vm287_vm6, %v271_v59, %v274_v9  ;;  %v295_v21 = vsel %vm287_vm6, %v274_v9, %v277_v10  ;;  %v299_v28 = vsel %vm287_vm6, %v277_v10, %v280_v18 }
  0x31   :  { %v92_v26 = vsel %vm90_vm8, %v91_v19, %v661_v8  ;;  %v292_v20 = vsel %vm290_vm10, %v280_v18, 2102212464  ;;  %v296_v27 = vsel %vm290_vm10, %v283_v23, 920167782  ;;  %v300_v32 = vsel %vm290_vm10, %v286_v24, 1326507024 }
  0x32   :  { %v93_v29 = vadd.s32 %v92_v26, %v88_v17  ;;  %v293_v30 = vsel %vm289_vm9, %v277_v10, %v292_v20  ;;  %v297_v31 = vsel %vm289_vm9, %v280_v18, %v296_v27  ;;  %v301_v36 = vsel %vm289_vm9, %v283_v23, %v300_v32 }
  0x33   :  { %v294_v33 = vsel %vm288_vm7, %v291_v25, %v293_v30  ;;  %v298_v35 = vsel %vm288_vm7, %v295_v21, %v297_v31  ;;  %v302_v38 = vsel %vm288_vm7, %v299_v28, %v301_v36  ;;  %v89_v57 = vadd.s32 %v660_v7, %v657_v6 }
  0x34   :  { %v94_v37 = vadd.s32 536870912, %v93_v29  ;;  %v678_v39 = vmul.u32.u64.low %v645_v22, %v298_v35  ;;  %v679_v40 = vmul.u32.u64.high %v645_v22, %v298_v35, %v678_v39  ;;  %v310_v44 = vmul.u32 %v645_v22, %v294_v33 }
  0x35   :  { %v682_v41 = vmul.u32.u64.low %v645_v22, %v302_v38  ;;  %v683_v42 = vmul.u32.u64.high %v645_v22, %v302_v38, %v682_v41  ;;  %vm125_vm8 = vweird.f32 %v631_v0 }
  0x36   :  { %v95_v43 = vshrl.u32 %v94_v37, 30  ;;  %v313_v46 = vadd.s32 1, %v679_v40 }
  0x37   :  { %vm312_vm11 = vc.u32 %v683_v42, %v678_v39  ;;  %v311_v13 = vadd.s32 %v678_v39, %v683_v42 }
  0x38   :  { %v96_v45 = vshll.u32 %v95_v43, 30  ;;  %v314_v34 = vsel %vm312_vm11, %v313_v46, %v679_v40  ;;  %v119_v6 = vsub.s32 4, %v95_v43 }
  0x39   :  { %v315_v48 = vadd.s32 %v314_v34, %v310_v44  ;;  %v25_v34 = vld [vmem:[#allocation2 + $0x3] sm:$0x1] }
  0x3a   :  { %v97_v47 = vsub.s32 %v93_v29, %v96_v45  ;;  %v120_v25 = vsel %vm35_vm14, %v119_v6, %v95_v43 }
  0x3b   :  { %v316_v50 = vadd.s32 536870912, %v315_v48  ;;  %v122_v28 = vsel %vm34_vm15, 0, %v120_v25 }
  0x3c   :  { %v99_v49 = vsub.s32 0, %v97_v47  ;;  %v229_v33 = vadd.s32 3, %v122_v28  ;;  %v126_v37 = vand.u32 3, %v122_v28 }
  0x3d   :  { %v317_v52 = vshrl.u32 %v316_v50, 30 }
  0x3e   :  { %v507_v51 = vmin.u32 %v99_v49, %v97_v47  ;;  %v230_v38 = vand.u32 3, %v229_v33  ;;  %vm131_vm2 = vcmp.eq.s32.totalorder %v126_v37, 2  ;;  %vm128_vm4 = vcmp.eq.s32.totalorder %v126_v37, 0 }
  0x3f   :  { %v318_v54 = vshll.u32 %v317_v52, 30  ;;  %v341_v32 = vsub.s32 4, %v317_v52  ;;  %vm127_vm6 = vcmp.lt.s32.totalorder %v126_v37, 2 }
  0x40   :  { %v101_v53 = vclz %v507_v51  ;;  %vm235_vm3 = vcmp.eq.s32.totalorder %v230_v38, 2  ;;  %vm232_vm5 = vcmp.eq.s32.totalorder %v230_v38, 0  ;;  %vm231_vm7 = vcmp.lt.s32.totalorder %v230_v38, 2 }
  0x41   :  { %v319_v56 = vsub.s32 %v315_v48, %v318_v54  ;;  %v342_v36 = vsel %vm257_vm0, %v341_v32, %v317_v52  ;;  %v27_v48 = vld [vmem:[#allocation2 + $0x4] sm:$0x1] }
  0x42   :  { %v508_v55 = vadd.s32 4294967294, %v101_v53  ;;  %v344_v41 = vsel %vm256_vm1, 0, %v342_v36 }
  0x43   :  { %v321_v58 = vsub.s32 0, %v319_v56  ;;  %v451_v45 = vadd.s32 3, %v344_v41  ;;  %v348_v53 = vand.u32 3, %v344_v41 }
  0x44   :  { %vm509_vm12 = vcmp.lt.s32.totalorder %v508_v55, 0 }
  0x45   :  { %v104_v22 = vsel %vm509_vm12, 0, %v508_v55  ;;  %v515_v62 = vmin.u32 %v321_v58, %v319_v56  ;;  %v452_v54 = vand.u32 3, %v451_v45  ;;  %vm353_vm9 = vcmp.eq.s32.totalorder %v348_v53, 2 }
  0x46   :  { %v105_v59 = vsub.s32 32, %v104_v22  ;;  %v106_v60 = vshll.u32 %v97_v47, %v104_v22  ;;  %v109_v61 = vsub.s32 4294967266, %v104_v22  ;;  %vm350_vm11 = vcmp.eq.s32.totalorder %v348_v53, 0 }
  0x47   :  { %v323_v5 = vclz %v515_v62  ;;  %vm457_vm10 = vcmp.eq.s32.totalorder %v452_v54, 2  ;;  %vm454_vm12 = vcmp.eq.s32.totalorder %v452_v54, 0 }
  0x48   :  { %v107_v63 = vshrl.u32 %v89_v57, %v105_v59  ;;  %v110_v3 = vadd.s32 127, %v109_v61  ;;  %v23_v59 = vld [vmem:[#allocation2] sm:$0x1] }
  0x49   :  { %v516_v10 = vadd.s32 4294967294, %v323_v5 }
  0x4a   :  { %v108_v8 = vor.u32 %v107_v63, %v106_v60  ;;  %v111_v9 = vshll.u32 %v110_v3, 23  ;;  %v28_v3 = vmul.f32 -11.53125, %v23_v59 }
  0x4b   :  { %vm517_vm13 = vcmp.lt.s32.totalorder %v516_v10, 0 }
  0x4c   :  { %v112_v11 = vor.u32 4788187, %v111_v9  ;;  %v115_v12 = vcvt.s32.f32 %v108_v8  ;;  %v326_v7 = vsel %vm517_vm13, 0, %v516_v10  ;;  %vm349_vm13 = vcmp.lt.s32.totalorder %v348_v53, 2 }
  0x4d   :  { %v327_v15 = vsub.s32 32, %v326_v7  ;;  %v328_v16 = vshll.u32 %v319_v56, %v326_v7  ;;  %v331_v17 = vsub.s32 4294967266, %v326_v7 }
  0x4e   :  { %v113_v14 = vand.u32 2147483647, %v112_v11 }
  0x4f   :  { %v329_v19 = vshrl.u32 %v311_v13, %v327_v15  ;;  %v332_v23 = vadd.s32 127, %v331_v17  ;;  %v29_v15 = vmul.f32 %v23_v59, %v23_v59 }
  0x50   :  { %v116_v18 = vmul.f32 %v115_v12, %v113_v14 }
  0x51   :  { %v330_v21 = vor.u32 %v329_v19, %v328_v16  ;;  %v333_v26 = vshll.u32 %v332_v23, 23 }
  0x52   :  { %v117_v24 = vxor.u32 2147483648, %v116_v18 }
  0x53   :  { %v334_v29 = vor.u32 4788187, %v333_v26  ;;  %v337_v30 = vcvt.s32.f32 %v330_v21 }
  0x54   :  { %v118_v20 = vsel %vm35_vm14, %v117_v24, %v116_v18  ;;  %vm453_vm14 = vcmp.lt.s32.totalorder %v452_v54, 2  ;;  %v30_v24 = vmul.f32 0.14414063, %v29_v15 }
  0x55   :  { %v121_v27 = vsel %vm34_vm15, %v631_v0, %v118_v20  ;;  %v335_v31 = vand.u32 2147483647, %v334_v29  ;;  %vm347_vm15 = vweird.f32 %v633_v1 }
  0x56   :  { %540 = vcosq.f32 %v121_v27 }
  0x57   :  { %542 = vsinq.f32 %v121_v27  ;;  %v338_v35 = vmul.f32 %v337_v30, %v335_v31 }
  0x59   :  { %v339_v2 = vxor.u32 2147483648, %v338_v35 }
  0x5b   :  { %v340_v39 = vsel %vm257_vm0, %v339_v2, %v338_v35 }
  0x5c   :  { %v343_v40 = vsel %vm256_vm1, %v633_v1, %v340_v39 }
  0x5d   :  { %544 = vcosq.f32 %v343_v40 }
  0x5e   :  { %546 = vsinq.f32 %v343_v40 }
  0x60   :  { %v541_v42 = vpop.eup %540 }
  0x61   :  { %v543_v43 = vpop.eup %542  ;;  %v132_v44 = vxor.u32 2147483648, %v541_v42 }
  0x62   :  { %v129_v4 = vxor.u32 2147483648, %v543_v43 }
  0x63   :  { %v133_v46 = vsel %vm131_vm2, %v132_v44, %v543_v43  ;;  %v237_v47 = vsel %vm235_vm3, %v132_v44, %v543_v43 }
  0x64   :  { %v130_v49 = vsel %vm128_vm4, %v541_v42, %v129_v4  ;;  %v234_v50 = vsel %vm232_vm5, %v541_v42, %v129_v4 }
  0x65   :  { %v134_v51 = vsel %vm127_vm6, %v130_v49, %v133_v46  ;;  %v238_v52 = vsel %vm231_vm7, %v234_v50, %v237_v47 }
  0x66   :  { %v135_v55 = vsel %vm125_vm8, nan, %v134_v51  ;;  %v239_v56 = vsel %vm125_vm8, nan, %v238_v52 }
  0x67   :  { %v240_v57 = vmul.f32 %v135_v55, %v25_v34  ;;  %v241_v22 = vmul.f32 %v239_v56, %v27_v48  ;;  %v545_v58 = vpop.eup %544 }
  0x68   :  { %v547_v0 = vpop.eup %546  ;;  %v354_v61 = vxor.u32 2147483648, %v545_v58 }
  0x69   :  { %v242_v60 = vadd.f32 %v241_v22, %v240_v57  ;;  %v351_v63 = vxor.u32 2147483648, %v547_v0 }
  0x6a   :  { %v355_v5 = vsel %vm353_vm9, %v354_v61, %v547_v0  ;;  %v459_v8 = vsel %vm457_vm10, %v354_v61, %v547_v0 }
  0x6b   :  { %v243_v62 = vmul.f32 0.8, %v242_v60  ;;  %v352_v10 = vsel %vm350_vm11, %v545_v58, %v351_v63  ;;  %v456_v11 = vsel %vm454_vm12, %v545_v58, %v351_v63 }
  0x6c   :  { %v356_v12 = vsel %vm349_vm13, %v352_v10, %v355_v5  ;;  %v460_v13 = vsel %vm453_vm14, %v456_v11, %v459_v8 }
  0x6d   :  { %v244_v9 = vmax.f32 %v243_v62, 0.0  ;;  %v357_v6 = vsel %vm347_vm15, nan, %v356_v12  ;;  %v461_v7 = vsel %vm347_vm15, nan, %v460_v13 }
  0x6e   :  { %v462_v17 = vmul.f32 %v357_v6, %v25_v34  ;;  %v463_v18 = vmul.f32 %v461_v7, %v27_v48 }
  0x6f   :  { %v245_v14 = vmul.f32 %v244_v9, %v244_v9  ;;  %v247_v16 = vmul.f32 %v244_v9, %v28_v3 }
  0x70   :  { %v464_v23 = vadd.f32 %v463_v18, %v462_v17 }
  0x71   :  { %v246_v19 = vmul.f32 1153.125, %v245_v14 }
  0x72   :  { %v465_v21 = vmul.f32 0.8, %v464_v23 }
  0x73   :  { %v248_v25 = vadd.f32 %v247_v16, %v246_v19 }
  0x74   :  { %v466_v1 = vmax.f32 %v465_v21, 0.0 }
  0x75   :  { %v249_v26 = vadd.f32 %v248_v25, %v30_v24 }
  0x76   :  { %v467_v20 = vmul.f32 %v466_v1, %v466_v1  ;;  %v469_v27 = vmul.f32 %v466_v1, %v28_v3 }
  0x77   :  { %v250_v29 = vmax.f32 %v249_v26, 0.0 }
  0x78   :  { %v468_v28 = vmul.f32 1153.125, %v467_v20 }
  0x79   :  { %v251_v32 = vmul.f32 %v250_v29, %v135_v55  ;;  %v252_v35 = vmul.f32 %v250_v29, %v239_v56 }
  0x7a   :  { %v470_v30 = vadd.f32 %v469_v27, %v468_v28 }
  0x7c   :  { %v471_v31 = vadd.f32 %v470_v30, %v30_v24 }
  0x7e   :  { %v472_v33 = vmax.f32 %v471_v31, 0.0 }
  0x80   :  { %v473_v2 = vmul.f32 %v472_v33, %v357_v6  ;;  %v474_v36 = vmul.f32 %v472_v33, %v461_v7 }
  0x82   :  { %v476_v37 = vadd.f32 %v473_v2, %v251_v32  ;;  %v475_v38 = vadd.f32 %v474_v36, %v252_v35  ;;  %v484_v39 = vsub.f32 %v251_v32, %v473_v2 }
  0x84   :  { %477 = vst [vmem:[#allocation5] sm:$0x1] %v476_v37  ;;  %479 = vst [vmem:[#allocation5 + $0x1] sm:$0x1] %v475_v38  ;;  %v480_v40 = vmul.f32 0.5, %v475_v38  ;;  %v483_v41 = vmul.f32 -2.0, %v475_v38 }
  0x85   :  { %v485_v42 = vmul.f32 0.8, %v484_v39 }
  0x86   :  { %482 = vst [vmem:[#allocation5 + $0x2] sm:$0x1] %v480_v40 }
  0x87   :  { %v486_v43 = vadd.f32 %v485_v42, %v483_v41 }
  0x89   :  { %488 = vst [vmem:[#allocation5 + $0x3] sm:$0x1] %v486_v43 }
  0x8a   :  { %581 = shalt.err (!%p578_p12)
}
  0x8b   :  { %s582_s25 = scalar_lea.hbm %s717_s1, 64 }
  0x8c   :  { %p583_p13 = scmp.ne.s32.totalorder %s717_s1, %s582_s25  ;;  %p586_p0 = scmp.lt.u32.totalorder %s582_s25, %s717_s1 }
  0x8e   :  { %p588_p1 = pnand %p586_p0, %p583_p13 }
  0x90   :  { %591 = shalt.err (!%p588_p1)
}
  0x91   :  { %500 = dma.vmem_to_hbm [thread:$0]  %s495_s21, 64, %s717_s1, [#allocation4], %s597_s17, %s597_s17, %s598_s18  }
  0x92   :  { %594 = dma.done.wait [#allocation4], 64  }
  0x93   :  { %595 = vsyncadd [#allocation4], 4294967232 }
  0x94   :  { %504 = vsyncpa [#allocation3], 1 }
  0x95   :  { %505 = vsyncpa [#allocation4], 1 }

</bundles_post_ra>
